<compile_context>
chip_gen: v5e
topology: v5e:2x2
jax: 0.10.0
libtpu: 0.0.40
codegen_flags: <defaults>
</compile_context>

<pallas_src>
import functools

import jax
import jax.numpy as jnp
from jax.experimental import pallas as pl
from jax.experimental.pallas import tpu as pltpu

LANE = 128
SUBLANE = 8
TILE_ROWS_MAX = 4096  # 4096 x 128 x 4B = 2 MiB per f32 input block


def _round_up(x, m):
    return ((x + m - 1) // m) * m


def _logmse_partial_kernel(pred_ref, act_ref, out_ref, *, tile_rows,
                           tiles_per_split, rows_valid, needs_mask):
    c = pl.program_id(0)  # core / split axis ("parallel")
    i = pl.program_id(1)  # reduction axis ("arbitrary", innermost)

    @pl.when(i == 0)
    def _init():
        out_ref[...] = jnp.zeros_like(out_ref)

    # Widen to f32 in-kernel; squared diff is pure-VPU elementwise work.
    d = pred_ref[...].astype(jnp.float32) - act_ref[...].astype(jnp.float32)
    d2 = d * d

    def _fold(x):
        # (tile_rows,128) -> (tile_rows//8, 8, 128), sum over the leading axis:
        # vreg-wise VPU adds into the lane-dense (8,128) resident accumulator.
        # The reshape does not cross (8,128) tile boundaries, so it is free.
        out_ref[...] += x.reshape(tile_rows // SUBLANE, SUBLANE, LANE).sum(axis=0)

    if not needs_mask:
        # Statically known: every grid step is a full, uniquely-owned tile.
        _fold(d2)
    else:
        row_base = (c * tiles_per_split + i) * tile_rows
        is_partial = row_base + tile_rows > rows_valid

        @pl.when(jnp.logical_not(is_partial))
        def _full_tile():
            _fold(d2)

        @pl.when(is_partial)
        def _tail_tile():
            # Mask rows past the true extent (out-of-bounds block contents are
            # undefined; clamped duplicate steps mask to zero entirely).
            local_row = jax.lax.broadcasted_iota(jnp.int32, (tile_rows, LANE), 0)
            masked = jnp.where(row_base + local_row < rows_valid, d2,
                               jnp.float32(0.0))
            _fold(masked)


def log_mse_loss(pred, actual, *, tile_rows_max=TILE_ROWS_MAX, num_splits=2):
    """log(mean((pred - actual)^2)) — matches torch.log(nn.MSELoss()(pred, actual))."""
    assert pred.shape == actual.shape
    n = pred.size
    assert n > 0

    p = pred.reshape(-1)
    a = actual.reshape(-1)

    # Lane alignment only: the flat array must be a multiple of 128 to form a
    # (rows, 128) slab.  Padded zeros contribute 0 to the squared-diff sum, so
    # the mean over the true N is unaffected.  (No padding happens for shapes
    # whose element count is already a multiple of 128, e.g. the test shape.)
    rem = (-n) % LANE
    if rem:
        # TODO(synk): a fully pad-free path for ragged tails would need a
        # manual DMA of the last <128 elements; the pad copy only triggers
        # when n % 128 != 0.
        p = jnp.pad(p, (0, rem))
        a = jnp.pad(a, (0, rem))

    rows = (n + rem) // LANE
    p = p.reshape(rows, LANE)
    a = a.reshape(rows, LANE)

    # Tile rows: big (2 MiB/block) when possible, always a multiple of 8.
    tile_rows = min(tile_rows_max, _round_up(rows, SUBLANE))
    total_tiles = pl.cdiv(rows, tile_rows)
    splits = min(num_splits, total_tiles)
    tiles_per_split = pl.cdiv(total_tiles, splits)

    # Static: does any step see a partial tile (array tail) or a clamped
    # duplicate step (uneven split)?  If not, skip emitting the mask path.
    needs_mask = (rows % tile_rows != 0) or (splits * tiles_per_split != total_tiles)

    def in_map(c, i):
        # Clamp so a split's trailing (fully out-of-range) step re-reads a
        # valid block; the in-kernel mask zeroes its contribution.
        return (jnp.minimum(c * tiles_per_split + i, total_tiles - 1), 0)

    kernel = functools.partial(
        _logmse_partial_kernel,
        tile_rows=tile_rows,
        tiles_per_split=tiles_per_split,
        rows_valid=rows,
        needs_mask=needs_mask,
    )

    partials = pl.pallas_call(
        kernel,
        out_shape=jax.ShapeDtypeStruct((splits * SUBLANE, LANE), jnp.float32),
        grid_spec=pltpu.PrefetchScalarGridSpec(
            num_scalar_prefetch=0,
            grid=(splits, tiles_per_split),
            in_specs=[
                pl.BlockSpec((tile_rows, LANE), in_map),
                pl.BlockSpec((tile_rows, LANE), in_map),
            ],
            # Lane-dense (8,128) resident accumulator per split.
            out_specs=pl.BlockSpec((SUBLANE, LANE), lambda c, i: (c, 0)),
        ),
        compiler_params=pltpu.CompilerParams(
            # Split axis shards across TensorCores (v7x); reduction axis is
            # innermost and output-resident.
            dimension_semantics=("parallel", "arbitrary"),
            vmem_limit_bytes=32 << 20,  # 2 inputs x 2 bufs x 2 MiB = 8 MiB used
        ),
    )(p, a)

    # Tiny epilogue on <= splits*8*128 floats: combine partials, mean, log.
    return jnp.log(jnp.sum(partials) / jnp.float32(n))


if __name__ == "__main__":
    # logMSELoss has no learnable parameters; only the elementwise+reduction
    # forward is implemented.
    key = jax.random.PRNGKey(0)
    k_pred, k_actual = jax.random.split(key)
    shape = (2, 4, 16, 16)  # NCHW, like a small UNet output
    pred = jax.random.normal(k_pred, shape, dtype=jnp.float32)
    actual = jax.random.normal(k_actual, shape, dtype=jnp.float32)

    loss = log_mse_loss(pred, actual)
    loss = jax.block_until_ready(loss)

    # Pure-JAX reference check.
    ref = jnp.log(jnp.mean((pred - actual) ** 2))
    assert jnp.allclose(loss, ref, rtol=1e-5, atol=1e-6), (loss, ref)

    print("KERNEL_OK")
</pallas_src>

<mosaic_0001>
module attributes {stable_mosaic.version = 11 : i64} {
  func.func @_logmse_partial_kernel(%arg0: i32, %arg1: i32, %arg2: memref<16x128xf32, #tpu.memory_space<vmem>>, %arg3: memref<16x128xf32, #tpu.memory_space<vmem>>, %arg4: memref<8x128xf32, #tpu.memory_space<vmem>>) attributes {dimension_semantics = [#tpu.dimension_semantics<parallel>, #tpu.dimension_semantics<arbitrary>], iteration_bounds = array<i64: 1, 1>, scalar_prefetch = 0 : i64, scratch_operands = 0 : i64, tpu.core_type = #tpu.core_type<tc>, window_params = [{transform_indices = @transform_0, window_bounds = array<i64: 16, 128>}, {transform_indices = @transform_1, window_bounds = array<i64: 16, 128>}, {transform_indices = @transform_2, window_bounds = array<i64: 8, 128>}]} {
    %c0_i32 = arith.constant 0 : i32
    %0 = arith.cmpi eq, %arg1, %c0_i32 : i32
    %1 = arith.extui %0 : i1 to i32
    %c0_i32_0 = arith.constant 0 : i32
    %2 = arith.cmpi ne, %1, %c0_i32_0 : i32
    scf.if %2 {
      %cst_8 = arith.constant 0.000000e+00 : f32
      %12 = vector.broadcast %cst_8 : f32 to vector<8x128xf32>
      %c0_9 = arith.constant 0 : index
      %c0_10 = arith.constant 0 : index
      %13 = vector.load %arg4[%c0_9, %c0_10] : memref<8x128xf32, #tpu.memory_space<vmem>>, vector<8x128xf32>
      tpu.vector_store %arg4[%c0_9, %c0_10], %12 {strides = array<i32>} : memref<8x128xf32, #tpu.memory_space<vmem>>, vector<8x128xf32>,
    } else {
    }
    %c0 = arith.constant 0 : index
    %c0_1 = arith.constant 0 : index
    %3 = vector.load %arg2[%c0, %c0_1] : memref<16x128xf32, #tpu.memory_space<vmem>>, vector<16x128xf32>
    %c0_2 = arith.constant 0 : index
    %c0_3 = arith.constant 0 : index
    %4 = vector.load %arg3[%c0_2, %c0_3] : memref<16x128xf32, #tpu.memory_space<vmem>>, vector<16x128xf32>
    %5 = arith.subf %3, %4 : vector<16x128xf32>
    %6 = arith.mulf %5, %5 : vector<16x128xf32>
    %c0_4 = arith.constant 0 : index
    %c0_5 = arith.constant 0 : index
    %7 = vector.load %arg4[%c0_4, %c0_5] : memref<8x128xf32, #tpu.memory_space<vmem>>, vector<8x128xf32>
    %8 = vector.shape_cast %6 : vector<16x128xf32> to vector<2x8x128xf32>
    %cst = arith.constant dense<0.000000e+00> : vector<8x128xf32>
    %9 = vector.multi_reduction <add>, %8, %cst [0] : vector<2x8x128xf32> to vector<8x128xf32>
    %10 = arith.addf %7, %9 : vector<8x128xf32>
    %c0_6 = arith.constant 0 : index
    %c0_7 = arith.constant 0 : index
    %11 = vector.load %arg4[%c0_6, %c0_7] : memref<8x128xf32, #tpu.memory_space<vmem>>, vector<8x128xf32>
    tpu.vector_store %arg4[%c0_6, %c0_7], %10 {strides = array<i32>} : memref<8x128xf32, #tpu.memory_space<vmem>>, vector<8x128xf32>,
    return
  }
  func.func @transform_0(%arg0: i32, %arg1: i32) -> (i32, i32) {
    %c1_i32 = arith.constant 1 : i32
    %0 = arith.muli %arg0, %c1_i32 : i32
    %1 = arith.addi %0, %arg1 : i32
    %c0_i32 = arith.constant 0 : i32
    %2 = arith.minsi %1, %c0_i32 : i32
    %c0_i32_0 = arith.constant 0 : i32
    %c0_i32_1 = arith.constant 0 : i32
    return %2, %c0_i32_0 : i32, i32
  }
  func.func @transform_1(%arg0: i32, %arg1: i32) -> (i32, i32) {
    %c1_i32 = arith.constant 1 : i32
    %0 = arith.muli %arg0, %c1_i32 : i32
    %1 = arith.addi %0, %arg1 : i32
    %c0_i32 = arith.constant 0 : i32
    %2 = arith.minsi %1, %c0_i32 : i32
    %c0_i32_0 = arith.constant 0 : i32
    %c0_i32_1 = arith.constant 0 : i32
    return %2, %c0_i32_0 : i32, i32
  }
  func.func @transform_2(%arg0: i32, %arg1: i32) -> (i32, i32) {
    %c0_i32 = arith.constant 0 : i32
    %c0_i32_0 = arith.constant 0 : i32
    return %arg0, %c0_i32 : i32, i32
  }
}

</mosaic_0001>

<bundles_post_ra>
// kernel: tpu_custom_call.1
= control target key start
LH: loop header
LB: loop body
LE: loop exit
PB: predicated region body
PF: predicated region fallthrough
CT: control target
= control target key end

     0   :  { %7 = vsyncpa [#allocation3], 0  ;;  %s216_s0 = inlined_call_operand.hbm [shape: f32[16,128], index: 0, kind: input, shape index: {}]   ;;  %s217_s1 = inlined_call_operand.hbm [shape: f32[16,128], index: 1, kind: input, shape index: {}]   ;;  %s218_s2 = inlined_call_operand.hbm [shape: f32[8,128], index: 2, kind: output, shape index: {}]  }
   0x1   :  { %8 = vsyncpa [#allocation6], 0 }
   0x2   :  { %9 = vsyncpa [#allocation4], 0  ;;  %s20_s11 = sshll.u32 %s216_s0, 4  ;;  %s187_s12 = smov [#allocation2]   ;;  %s21_s11 = int_to_ptr.hbm [resolvable:$true] %s20_s11 }
   0x3   :  { %s22_s13 = sshll.u32 %s187_s12, 4  ;;  %s39_s16 = sshll.u32 %s217_s1, 4  ;;  %s23_s13 = int_to_ptr.vmem [resolvable:$true] %s22_s13  ;;  %s40_s16 = int_to_ptr.hbm [resolvable:$true] %s39_s16 }
   0x4   :  { %s188_s17 = smov 128   ;;  %s189_s18 = smov 8  }
   0x5   :  { %28 = dma.hbm_to_vmem [thread:$0]  %s21_s11, 256, %s23_s13, [#allocation3], %s188_s17, %s188_s17, %s189_s18  }
   0x6   :  { %s190_s19 = smov [#allocation5]  }
   0x7   :  { %s41_s20 = sshll.u32 %s190_s19, 4  ;;  %s42_s20 = int_to_ptr.vmem [resolvable:$true] %s41_s20 }
   0x8   :  { %47 = dma.hbm_to_vmem [thread:$0]  %s40_s16, 256, %s42_s20, [#allocation6], %s188_s17, %s188_s17, %s189_s18  }
   0x9   :  { %181 = dma.done.wait [#allocation3], 256  }
   0xa   :  { %182 = vsyncadd [#allocation3], 4294967040 }
   0xb   :  { %183 = dma.done.wait [#allocation6], 256  }
   0xc   :  { %184 = vsyncadd [#allocation6], 4294967040  ;;  %v69_v0 = vld [vmem:[#allocation2] sm:$0xff]  ;;  %v70_v1 = vld [vmem:[#allocation2 + $0x8] sm:$0xff]  ;;  %s191_s0 = smov [#allocation7]   ;;  %s88_s23 = sshll.u32 %s218_s2, 4  ;;  %s89_s23 = int_to_ptr.hbm [resolvable:$true] %s88_s23 }
   0xd   :  { %v71_v2 = vld [vmem:[#allocation5] sm:$0xff]  ;;  %v72_v3 = vld [vmem:[#allocation5 + $0x8] sm:$0xff]  ;;  %s86_s1 = sshll.u32 %s191_s0, 4  ;;  %s87_s1 = int_to_ptr.vmem [resolvable:$true] %s86_s1 }
   0xe   :  { %v73_v4 = vsub.f32 %v69_v0, %v71_v2  ;;  %v74_v5 = vsub.f32 %v70_v1, %v72_v3 }
  0x10   :  { %v75_v6 = vmul.f32 %v73_v4, %v73_v4  ;;  %v76_v7 = vmul.f32 %v74_v5, %v74_v5 }
  0x12   :  { %v78_v8 = vadd.f32 %v76_v7, %v75_v6 }
  0x14   :  { %80 = vst [vmem:[#allocation7] sm:$0xff] %v78_v8 }
  0x15   :  { %91 = dma.vmem_to_hbm [thread:$0]  %s87_s1, 128, %s89_s23, [#allocation4]  }
  0x16   :  { %185 = dma.done.wait [#allocation4], 128  }
  0x17   :  { %186 = vsyncadd [#allocation4], 4294967168 }
  0x18   :  { %96 = vsyncpa [#allocation3], 1 }
  0x19   :  { %97 = vsyncpa [#allocation6], 1 }
  0x1a   :  { %98 = vsyncpa [#allocation4], 1 }

</bundles_post_ra>
